<compile_context>
chip_gen: v7x
topology: tpu7x:2x2x1
jax: 0.10.0
libtpu: 0.0.40
codegen_flags: <defaults>
</compile_context>

<pallas_src>
import functools

import jax
import jax.numpy as jnp
from jax.experimental import pallas as pl
from jax.experimental.pallas import tpu as pltpu


def _round_up(x: int, m: int) -> int:
    return ((x + m - 1) // m) * m


def _pick_batch_tile(b8: int, max_tb: int = 1024) -> int:
    """Pick a batch tile that is a multiple of 8, divides b8 exactly (no padded
    overshoot), is <= max_tb, and — when the batch is large enough — leaves the
    grid with >= 2 steps so both v7x TensorCores get work."""
    cap = b8 if b8 < 16 else b8 // 2
    cap = min(max_tb, cap)
    cap = max(8, (cap // 8) * 8)
    for tb in range(cap, 7, -8):
        if b8 % tb == 0:
            return tb
    return 8


def _fc_kernel(*refs, num_layers: int):
    """refs = (x_ref, w0_ref, b0_ref, ..., w{L-1}_ref, b{L-1}_ref, o_ref).

    Whole MLP for one batch tile. Matmul inputs are bf16 (MXU-friendly), the
    accumulator / bias-add / tanh are f32 (safe on v5e which lacks bf16 VPU/EUP).
    """
    x_ref = refs[0]
    o_ref = refs[-1]

    h = x_ref[...]                                     # bf16 (tb, d_in)
    for i in range(num_layers):
        w_ref = refs[1 + 2 * i]
        b_ref = refs[2 + 2 * i]
        acc = jnp.dot(h, w_ref[...], preferred_element_type=jnp.float32)
        acc = acc + b_ref[...]                         # (1, Dpad) f32 bias broadcast
        if i < num_layers - 1:
            acc = jnp.tanh(acc)                        # f32 EUP transcendental
            h = acc.astype(jnp.bfloat16)               # bf16 for the next MXU pass
        else:
            h = acc
    o_ref[...] = h.astype(o_ref.dtype)


def prepare_fc_params(params):
    """Pad / cast weights & biases ONCE (outside the jitted forward).

    Weights -> bf16, output dim padded to 128 lanes; layer-0's K is left at its
    true width so x can be passed unpadded. Biases -> f32 rows padded to 128
    lanes. Zero padding is exact: padded K-rows are zero, padded output columns
    get zero weight columns + zero bias, and tanh(0) = 0.

    params: list of (w:(Din,Dout), b:(Dout,)) with weights stored transposed vs.
            nn.Linear so the kernel computes x @ W + b directly on the MXU.
    """
    prepared = []
    for i, (w, b) in enumerate(params):
        din, dout = w.shape
        dip = din if i == 0 else _round_up(din, 128)
        dop = _round_up(dout, 128)
        w_p = jnp.pad(w, ((0, dip - din), (0, dop - dout))).astype(jnp.bfloat16)
        b_p = jnp.pad(b, (0, dop - dout)).astype(jnp.float32).reshape(1, dop)
        prepared.append((w_p, b_p))
    return prepared


@functools.partial(jax.jit, static_argnames=("out_features",))
def fully_connected_forward(layers, x, *, out_features):
    """FullyConnected.forward as one fused Pallas kernel.

    layers: output of prepare_fc_params (pre-padded bf16 weights, f32 biases).
    x:      (B, sizes[0]) in its true (unpadded) feature width.
    """
    B, d_in = x.shape
    num_layers = len(layers)
    d_out_pad = layers[-1][0].shape[1]

    # Batch tiling: pad only to a sublane multiple (no overshoot past b8); tb
    # divides b8 exactly and gives >= 2 grid steps when the batch allows it.
    b8 = _round_up(B, 8)
    tb = _pick_batch_tile(b8)
    grid = (b8 // tb,)

    # Only the batch dim is padded; padded rows are sliced off below.
    x_p = jnp.pad(x.astype(jnp.bfloat16), ((0, b8 - B), (0, 0)))

    inputs = [x_p]
    in_specs = [pl.BlockSpec((tb, d_in), lambda i: (i, 0))]   # true-width x block
    for w_p, b_p in layers:
        inputs += [w_p, b_p]
        in_specs += [
            pl.BlockSpec(w_p.shape, lambda i: (0, 0)),        # resident full weight
            pl.BlockSpec(b_p.shape, lambda i: (0, 0)),        # lane-dense bias row
        ]

    kernel = functools.partial(_fc_kernel, num_layers=num_layers)
    out_p = pl.pallas_call(
        kernel,
        out_shape=jax.ShapeDtypeStruct((b8, d_out_pad), x.dtype),
        grid=grid,
        in_specs=in_specs,
        out_specs=pl.BlockSpec((tb, d_out_pad), lambda i: (i, 0)),
        compiler_params=pltpu.CompilerParams(
            dimension_semantics=("parallel",),     # megacore / v7x 2-TC split
            vmem_limit_bytes=32 * 1024 * 1024,     # ample headroom on v5e/v6e/v7x
        ),
    )(*inputs)

    return out_p[:B, :out_features]


def init_fully_connected(key, sizes, dtype=jnp.float32):
    """Deterministic param init matching nn.Linear shapes (weight stored as (in,out))."""
    params = []
    for i in range(len(sizes) - 1):
        fan_in, fan_out = sizes[i], sizes[i + 1]
        key, kw, kb = jax.random.split(key, 3)
        bound = 1.0 / jnp.sqrt(jnp.asarray(fan_in, dtype))
        w = jax.random.uniform(kw, (fan_in, fan_out), dtype, -bound, bound)
        b = jax.random.uniform(kb, (fan_out,), dtype, -bound, bound)
        params.append((w, b))
    return params


if __name__ == "__main__":
    key = jax.random.PRNGKey(0)
    sizes = [16, 32, 24, 8]       # FullyConnected(sizes=[16, 32, 24, 8])
    batch = 2

    kparams, kx = jax.random.split(key)
    params = init_fully_connected(kparams, sizes)
    x = jax.random.normal(kx, (batch, sizes[0]), jnp.float32)

    layers = prepare_fc_params(params)          # pad / cast once, outside the forward
    out = fully_connected_forward(layers, x, out_features=sizes[-1])
    jax.block_until_ready(out)

    # Pure-JAX f32 reference of the same math (kernel uses bf16 MXU inputs,
    # so tolerance is loosened accordingly).
    ref = x
    for i, (w, b) in enumerate(params):
        ref = ref @ w + b
        if i < len(params) - 1:
            ref = jnp.tanh(ref)
    assert out.shape == (batch, sizes[-1])
    assert out.dtype == x.dtype
    assert jnp.allclose(out, ref, atol=5e-2, rtol=5e-2), float(jnp.max(jnp.abs(out - ref)))

    print("KERNEL_OK")
</pallas_src>

<mosaic_0001>
module attributes {stable_mosaic.version = 11 : i64} {
  func.func @_fc_kernel(%arg0: i32, %arg1: memref<8x16xbf16, #tpu.memory_space<vmem>>, %arg2: memref<16x128xbf16, #tpu.memory_space<vmem>>, %arg3: memref<1x128xf32, #tpu.memory_space<vmem>>, %arg4: memref<128x128xbf16, #tpu.memory_space<vmem>>, %arg5: memref<1x128xf32, #tpu.memory_space<vmem>>, %arg6: memref<128x128xbf16, #tpu.memory_space<vmem>>, %arg7: memref<1x128xf32, #tpu.memory_space<vmem>>, %arg8: memref<8x128xf32, #tpu.memory_space<vmem>>) attributes {dimension_semantics = [#tpu.dimension_semantics<parallel>], iteration_bounds = array<i64: 1>, scalar_prefetch = 0 : i64, scratch_operands = 0 : i64, tpu.core_type = #tpu.core_type<tc>, window_params = [{transform_indices = @transform_0, window_bounds = array<i64: 8, 16>}, {pipeline_mode = #tpu.pipeline_mode<synchronous>, transform_indices = @transform_1, window_bounds = array<i64: 16, 128>}, {pipeline_mode = #tpu.pipeline_mode<synchronous>, transform_indices = @transform_2, window_bounds = array<i64: 1, 128>}, {pipeline_mode = #tpu.pipeline_mode<synchronous>, transform_indices = @transform_3, window_bounds = array<i64: 128, 128>}, {pipeline_mode = #tpu.pipeline_mode<synchronous>, transform_indices = @transform_4, window_bounds = array<i64: 1, 128>}, {pipeline_mode = #tpu.pipeline_mode<synchronous>, transform_indices = @transform_5, window_bounds = array<i64: 128, 128>}, {pipeline_mode = #tpu.pipeline_mode<synchronous>, transform_indices = @transform_6, window_bounds = array<i64: 1, 128>}, {transform_indices = @transform_7, window_bounds = array<i64: 8, 128>}]} {
    %c0 = arith.constant 0 : index
    %c0_0 = arith.constant 0 : index
    %0 = vector.load %arg1[%c0, %c0_0] : memref<8x16xbf16, #tpu.memory_space<vmem>>, vector<8x16xbf16>
    %c0_1 = arith.constant 0 : index
    %c0_2 = arith.constant 0 : index
    %1 = vector.load %arg2[%c0_1, %c0_2] : memref<16x128xbf16, #tpu.memory_space<vmem>>, vector<16x128xbf16>
    %cst = arith.constant dense<0.000000e+00> : vector<8x128xf32>
    %2 = tpu.matmul %0, %1, %cst {dimension_numbers = #tpu.dot_dimension_numbers<[1], [0], [0], [1], [0, 0, 1, 1], [], []>} : vector<8x16xbf16>, vector<16x128xbf16>, vector<8x128xf32> -> vector<8x128xf32>
    %c0_3 = arith.constant 0 : index
    %c0_4 = arith.constant 0 : index
    %3 = vector.load %arg3[%c0_3, %c0_4] : memref<1x128xf32, #tpu.memory_space<vmem>>, vector<1x128xf32>
    %4 = vector.broadcast %3 : vector<1x128xf32> to vector<8x128xf32>
    %5 = arith.addf %2, %4 : vector<8x128xf32>
    %6 = math.tanh %5 : vector<8x128xf32>
    %7 = arith.truncf %6 : vector<8x128xf32> to vector<8x128xbf16>
    %c0_5 = arith.constant 0 : index
    %c0_6 = arith.constant 0 : index
    %8 = vector.load %arg4[%c0_5, %c0_6] : memref<128x128xbf16, #tpu.memory_space<vmem>>, vector<128x128xbf16>
    %cst_7 = arith.constant dense<0.000000e+00> : vector<8x128xf32>
    %9 = tpu.matmul %7, %8, %cst_7 {dimension_numbers = #tpu.dot_dimension_numbers<[1], [0], [0], [1], [0, 0, 1, 1], [], []>} : vector<8x128xbf16>, vector<128x128xbf16>, vector<8x128xf32> -> vector<8x128xf32>
    %c0_8 = arith.constant 0 : index
    %c0_9 = arith.constant 0 : index
    %10 = vector.load %arg5[%c0_8, %c0_9] : memref<1x128xf32, #tpu.memory_space<vmem>>, vector<1x128xf32>
    %11 = vector.broadcast %10 : vector<1x128xf32> to vector<8x128xf32>
    %12 = arith.addf %9, %11 : vector<8x128xf32>
    %13 = math.tanh %12 : vector<8x128xf32>
    %14 = arith.truncf %13 : vector<8x128xf32> to vector<8x128xbf16>
    %c0_10 = arith.constant 0 : index
    %c0_11 = arith.constant 0 : index
    %15 = vector.load %arg6[%c0_10, %c0_11] : memref<128x128xbf16, #tpu.memory_space<vmem>>, vector<128x128xbf16>
    %cst_12 = arith.constant dense<0.000000e+00> : vector<8x128xf32>
    %16 = tpu.matmul %14, %15, %cst_12 {dimension_numbers = #tpu.dot_dimension_numbers<[1], [0], [0], [1], [0, 0, 1, 1], [], []>} : vector<8x128xbf16>, vector<128x128xbf16>, vector<8x128xf32> -> vector<8x128xf32>
    %c0_13 = arith.constant 0 : index
    %c0_14 = arith.constant 0 : index
    %17 = vector.load %arg7[%c0_13, %c0_14] : memref<1x128xf32, #tpu.memory_space<vmem>>, vector<1x128xf32>
    %18 = vector.broadcast %17 : vector<1x128xf32> to vector<8x128xf32>
    %19 = arith.addf %16, %18 : vector<8x128xf32>
    %c0_15 = arith.constant 0 : index
    %c0_16 = arith.constant 0 : index
    %20 = vector.load %arg8[%c0_15, %c0_16] : memref<8x128xf32, #tpu.memory_space<vmem>>, vector<8x128xf32>
    tpu.vector_store %arg8[%c0_15, %c0_16], %19 {strides = array<i32>} : memref<8x128xf32, #tpu.memory_space<vmem>>, vector<8x128xf32>,
    return
  }
  func.func @transform_0(%arg0: i32) -> (i32, i32) {
    %c0_i32 = arith.constant 0 : i32
    %c0_i32_0 = arith.constant 0 : i32
    return %arg0, %c0_i32 : i32, i32
  }
  func.func @transform_1(%arg0: i32) -> (i32, i32) {
    %c0_i32 = arith.constant 0 : i32
    %c0_i32_0 = arith.constant 0 : i32
    %c0_i32_1 = arith.constant 0 : i32
    return %c0_i32, %c0_i32_0 : i32, i32
  }
  func.func @transform_2(%arg0: i32) -> (i32, i32) {
    %c0_i32 = arith.constant 0 : i32
    %c0_i32_0 = arith.constant 0 : i32
    %c0_i32_1 = arith.constant 0 : i32
    return %c0_i32, %c0_i32_0 : i32, i32
  }
  func.func @transform_3(%arg0: i32) -> (i32, i32) {
    %c0_i32 = arith.constant 0 : i32
    %c0_i32_0 = arith.constant 0 : i32
    %c0_i32_1 = arith.constant 0 : i32
    return %c0_i32, %c0_i32_0 : i32, i32
  }
  func.func @transform_4(%arg0: i32) -> (i32, i32) {
    %c0_i32 = arith.constant 0 : i32
    %c0_i32_0 = arith.constant 0 : i32
    %c0_i32_1 = arith.constant 0 : i32
    return %c0_i32, %c0_i32_0 : i32, i32
  }
  func.func @transform_5(%arg0: i32) -> (i32, i32) {
    %c0_i32 = arith.constant 0 : i32
    %c0_i32_0 = arith.constant 0 : i32
    %c0_i32_1 = arith.constant 0 : i32
    return %c0_i32, %c0_i32_0 : i32, i32
  }
  func.func @transform_6(%arg0: i32) -> (i32, i32) {
    %c0_i32 = arith.constant 0 : i32
    %c0_i32_0 = arith.constant 0 : i32
    %c0_i32_1 = arith.constant 0 : i32
    return %c0_i32, %c0_i32_0 : i32, i32
  }
  func.func @transform_7(%arg0: i32) -> (i32, i32) {
    %c0_i32 = arith.constant 0 : i32
    %c0_i32_0 = arith.constant 0 : i32
    return %arg0, %c0_i32 : i32, i32
  }
}

</mosaic_0001>

<bundles_post_ra>
// kernel: fully_connected_forward.1
= control target key start
LH: loop header
LB: loop body
LE: loop exit
PB: predicated region body
PF: predicated region fallthrough
CT: control target
= control target key end

     0   :  { %12 = vsyncpa [#allocation3], 0  ;;  %s618_s0 = inlined_call_operand.vmem [shape: bf16[8,16], index: 0, kind: input, shape index: {}]   ;;  %s619_s1 = inlined_call_operand.vmem [shape: bf16[16,128], index: 1, kind: input, shape index: {}]   ;;  %s620_s2 = inlined_call_operand.vmem [shape: f32[1,128], index: 2, kind: input, shape index: {}]   ;;  %s621_s3 = inlined_call_operand.hbm [shape: bf16[128,128], index: 3, kind: input, shape index: {}]   ;;  %s622_s4 = inlined_call_operand.vmem [shape: f32[1,128], index: 4, kind: input, shape index: {}]   ;;  %s623_s5 = inlined_call_operand.hbm [shape: bf16[128,128], index: 5, kind: input, shape index: {}]   ;;  %s624_s6 = inlined_call_operand.vmem [shape: f32[1,128], index: 6, kind: input, shape index: {}]   ;;  %s625_s7 = inlined_call_operand.vmem [shape: f32[8,128], index: 7, kind: output, shape index: {}]  }
   0x1   :  { %13 = vsyncpa [#allocation5], 0  ;;  %s510_s24 = smov [#allocation2]   ;;  %s462_s28 = scalar_lea.hbm %s621_s3, 1024 }
   0x2   :  { %s25_s25 = sshll.u32 %s510_s24, 4  ;;  %p463_p0 = scmp.ne.s32.totalorder %s621_s3, %s462_s28  ;;  %s26_s25 = int_to_ptr.vmem [resolvable:$true] %s25_s25 }
   0x3   :  { %p466_p1 = scmp.lt.u32.totalorder %s462_s28, %s621_s3 }
   0x5   :  { %p468_p2 = pnand %p466_p1, %p463_p0 }
   0x7   :  { %471 = shalt.err (!%p468_p2)
}
   0x8   :  { %s472_s10 = scalar_lea.vmem %s26_s25, 1024  ;;  %p477_p4 = scmp.lt.s32.totalorder %s26_s25, %s26_s25 }
   0x9   :  { %p473_p3 = scmp.ne.s32.totalorder %s26_s25, %s472_s10  ;;  %p478_p5 = scmp.lt.s32.totalorder %s472_s10, %s472_s10 }
   0xb   :  { %p479_p6 = por %p478_p5, %p477_p4 }
   0xd   :  { %p480_p7 = pnand %p479_p6, %p473_p3 }
   0xf   :  { %483 = shalt.err (!%p480_p7)
}
  0x10   :  { %s511_s11 = smov 64   ;;  %s512_s12 = smov 4  }
  0x11   :  { %31 = dma.hbm_to_vmem [thread:$0]  %s621_s3, 1024, %s26_s25, [#allocation3], %s511_s11, %s511_s11, %s512_s12  }
  0x12   :  { %s513_s15 = smov [#allocation4]   ;;  %s484_s19 = scalar_lea.hbm %s623_s5, 1024 }
  0x13   :  { %s39_s16 = sshll.u32 %s513_s15, 4  ;;  %p485_p8 = scmp.ne.s32.totalorder %s623_s5, %s484_s19  ;;  %s40_s16 = int_to_ptr.vmem [resolvable:$true] %s39_s16 }
  0x14   :  { %p488_p9 = scmp.lt.u32.totalorder %s484_s19, %s623_s5 }
  0x16   :  { %p490_p10 = pnand %p488_p9, %p485_p8 }
  0x18   :  { %493 = shalt.err (!%p490_p10)
}
  0x19   :  { %s494_s24 = scalar_lea.vmem %s40_s16, 1024  ;;  %p499_p12 = scmp.lt.s32.totalorder %s40_s16, %s40_s16 }
  0x1a   :  { %p495_p11 = scmp.ne.s32.totalorder %s40_s16, %s494_s24  ;;  %p500_p13 = scmp.lt.s32.totalorder %s494_s24, %s494_s24 }
  0x1c   :  { %p501_p0 = por %p500_p13, %p499_p12 }
  0x1e   :  { %p502_p1 = pnand %p501_p0, %p495_p11 }
  0x20   :  { %505 = shalt.err (!%p502_p1)
}
  0x21   :  { %45 = dma.hbm_to_vmem [thread:$0]  %s623_s5, 1024, %s40_s16, [#allocation5], %s511_s11, %s511_s11, %s512_s12  }
  0x22   :  { %506 = dma.done.wait [#allocation3], 1024  }
  0x23   :  { %507 = vsyncadd [#allocation3], 4294966272 }
  0x24   :  { %508 = dma.done.wait [#allocation5], 1024  }
  0x25   :  { %509 = vsyncadd [#allocation5], 4294966272  ;;  %v514_v0 = vmov 0.0   ;;  %vm515_vm0 = vmmov 0   ;;  %v441_v1 = vld [vmem:[%s619_s1] sm:$0xff]   ;;  %vm71_vm1 = vcmask 130048  }
  0x26   :  { %389 = vmatprep.subr.bf16.mxu0 %v514_v0  ;;  %391 = vmatprep.mubr.msk.bf16.mxu0 %vm515_vm0, %v514_v0  ;;  %v55_v2 = vld [vmem:[%s618_s0] sm:$0xf]  ;;  %v443_v4 = vld [vmem:[#allocation2 + $0x8] sm:$0xff]   ;;  %v444_v5 = vld [vmem:[#allocation2 + $0x10] sm:$0xff]  }
  0x27   :  { %395 = vmatprep.subr.bf16.mxu1 %v514_v0  ;;  %411 = vmatprep.mubr.msk.bf16.mxu1 %vm515_vm0, %v514_v0  ;;  %v442_v3 = vld [vmem:[#allocation2] sm:$0xff]   ;;  %v445_v6 = vld [vmem:[#allocation2 + $0x18] sm:$0xff]   ;;  %v447_v8 = vld [vmem:[#allocation2 + $0x28] sm:$0xff]  }
  0x28   :  { %390 = vmatpush3.bf16.msra.mxu0 %v441_v1  ;;  %396 = vmatpush3.bf16.msra.mxu1 %v442_v3  ;;  %v446_v7 = vld [vmem:[#allocation2 + $0x20] sm:$0xff]   ;;  %v448_v9 = vld [vmem:[#allocation2 + $0x30] sm:$0xff]   ;;  %v449_v10 = vld [vmem:[#allocation2 + $0x38] sm:$0xff]  }
  0x29   :  { %415 = vmatprep.subr.bf16.mxu0 %v514_v0  ;;  %397 = vmatprep.subr.bf16.mxu1 %v514_v0  ;;  %v450_v11 = vld [vmem:[#allocation4] sm:$0xff]   ;;  %v451_v12 = vld [vmem:[#allocation4 + $0x8] sm:$0xff]   ;;  %v452_v13 = vld [vmem:[#allocation4 + $0x10] sm:$0xff]  }
  0x2a   :  { %v453_v14 = vld [vmem:[#allocation4 + $0x18] sm:$0xff]   ;;  %v348_v15 = vld [vmem:[%s620_s2] ss:$0 sm:$0xff]  ;;  %v455_v24 = vld [vmem:[#allocation4 + $0x28] sm:$0xff]  }
  0x2b   :  { %392 = vmatmul.mubr.msk.bf16.vlgmr.msra.gmra.mrb[0].mxu0 %vm71_vm1, %v55_v2  ;;  %v454_v23 = vld [vmem:[#allocation4 + $0x20] sm:$0xff]   ;;  %v456_v25 = vld [vmem:[#allocation4 + $0x30] sm:$0xff]   ;;  %v457_v26 = vld [vmem:[#allocation4 + $0x38] sm:$0xff]  }
  0x2c   :  { %431 = vmatprep.mubr.msk.bf16.mxu0 %vm515_vm0, %v514_v0  ;;  %398 = vmatpush3.bf16.msra.mxu1 %v443_v4  ;;  %v351_v27 = vld [vmem:[%s622_s4] ss:$0 sm:$0xff] }
  0x2d   :  { %399 = vmatprep.subr.bf16.mxu1 %v514_v0  ;;  %416 = vmatpush3.bf16.msra.mxu0 %v450_v11  ;;  %v360_v35 = vld [vmem:[%s624_s6] ss:$0 sm:$0xff] }
  0x2e   :  { %417 = vmatprep.subr.bf16.mxu0 %v514_v0 }
  0x30   :  { %400 = vmatpush3.bf16.msra.mxu1 %v444_v5 }
  0x31   :  { %401 = vmatprep.subr.bf16.mxu1 %v514_v0  ;;  %418 = vmatpush3.bf16.msra.mxu0 %v451_v12 }
  0x32   :  { %419 = vmatprep.subr.bf16.mxu0 %v514_v0 }
  0x34   :  { %402 = vmatpush3.bf16.msra.mxu1 %v445_v6 }
  0x35   :  { %403 = vmatprep.subr.bf16.mxu1 %v514_v0  ;;  %420 = vmatpush3.bf16.msra.mxu0 %v452_v13 }
  0x36   :  { %421 = vmatprep.subr.bf16.mxu0 %v514_v0 }
  0x38   :  { %404 = vmatpush3.bf16.msra.mxu1 %v446_v7 }
  0x39   :  { %405 = vmatprep.subr.bf16.mxu1 %v514_v0  ;;  %422 = vmatpush3.bf16.msra.mxu0 %v453_v14 }
  0x3a   :  { %423 = vmatprep.subr.bf16.mxu0 %v514_v0 }
  0x3c   :  { %406 = vmatpush3.bf16.msra.mxu1 %v447_v8 }
  0x3d   :  { %407 = vmatprep.subr.bf16.mxu1 %v514_v0  ;;  %424 = vmatpush3.bf16.msra.mxu0 %v454_v23 }
  0x3e   :  { %425 = vmatprep.subr.bf16.mxu0 %v514_v0 }
  0x40   :  { %408 = vmatpush3.bf16.msra.mxu1 %v448_v9 }
  0x41   :  { %409 = vmatprep.subr.bf16.mxu1 %v514_v0  ;;  %426 = vmatpush3.bf16.msra.mxu0 %v455_v24 }
  0x42   :  { %427 = vmatprep.subr.bf16.mxu0 %v514_v0 }
  0x44   :  { %410 = vmatpush3.bf16.msra.mxu1 %v449_v10 }
  0x45   :  { %428 = vmatpush3.bf16.msra.mxu0 %v456_v25 }
  0x46   :  { %429 = vmatprep.subr.bf16.mxu0 %v514_v0 }
  0x49   :  { %430 = vmatpush3.bf16.msra.mxu0 %v457_v26 }
  0xfe   :  { %v109_v16 = vpop.f32.mrb[0].mxu0 }
  0xff   :  { %v110_v17 = vadd.f32 %v348_v15, %v109_v16  ;;  %v393_v18 = vpop.f32.mrb[1].mxu0 }
 0x100   :  { %v112_v19 = vpop.f32.mrb[2].mxu0 }
 0x101   :  { %458 = vtanh.f32 %v110_v17  ;;  %v394_v20 = vpop.f32.mrb[3].mxu0 }
 0x10b   :  { %v459_v21 = vpop.eup %458 }
 0x10c   :  { %v116_v22 = vpack.c.bf16 %v459_v21, %v459_v21 }
 0x10e   :  { %412 = vmatmul.mubr.bf16.vlgmr.msra.gmra.mrb[0].mxu1 %v116_v22 }
 0x1e1   :  { %v222_v28 = vpop.f32.mrb[0].mxu1 }
 0x1e2   :  { %v223_v29 = vadd.f32 %v351_v27, %v222_v28  ;;  %v413_v30 = vpop.f32.mrb[1].mxu1 }
 0x1e3   :  { %v225_v31 = vpop.f32.mrb[2].mxu1 }
 0x1e4   :  { %460 = vtanh.f32 %v223_v29  ;;  %v414_v32 = vpop.f32.mrb[3].mxu1 }
 0x1ee   :  { %v461_v33 = vpop.eup %460 }
 0x1ef   :  { %v229_v34 = vpack.c.bf16 %v461_v33, %v461_v33 }
 0x1f1   :  { %432 = vmatmul.mubr.bf16.vlgmr.msra.gmra.mrb[4].mxu0 %v229_v34 }
 0x2c4   :  { %v335_v36 = vpop.f32.mrb[4].mxu0 }
 0x2c5   :  { %v336_v37 = vadd.f32 %v360_v35, %v335_v36  ;;  %v433_v38 = vpop.f32.mrb[5].mxu0 }
 0x2c6   :  { %v338_v39 = vpop.f32.mrb[6].mxu0 }
 0x2c7   :  { %341 = vst [vmem:[%s625_s7] sm:$0xff] %v336_v37  ;;  %v434_v40 = vpop.f32.mrb[7].mxu0 }
 0x2c8   :  { %346 = vsyncpa [#allocation3], 1 }
 0x2c9   :  { %347 = vsyncpa [#allocation5], 1 }

</bundles_post_ra>
